<compile_context>
chip_gen: v7x
topology: tpu7x:2x2x1
jax: 0.10.0
libtpu: 0.0.40
codegen_flags: <defaults>
</compile_context>

<pallas_src>
import math
from functools import partial

import numpy as np
import jax
import jax.numpy as jnp
from jax.experimental import pallas as pl
from jax.experimental.pallas import tpu as pltpu


# --------------------------------------------------------------------------
# Pallas kernels
# --------------------------------------------------------------------------

def _fused_heads_kernel(adj_ref, x_ref, w_ref, out_ref, hc_ref, *, A, H, D, B, N):
    """All GCN heads, softmax/relu/mask, degree, att score, H_coarse: 1 step."""
    adj = adj_ref[...]                       # [BN, BN] bf16, block-diagonal
    x = x_ref[...]                           # [BN, D+1] bf16, last col = node mask
    w = w_ref[...]                           # [D+1, 128] bf16 (all heads, zero-padded)

    # adj @ x once; degree is the appended mask column (free on the MXU).
    ax = jnp.dot(adj, x, preferred_element_type=jnp.float32)           # [BN, D+1]
    mask_col = x[:, D:D + 1].astype(jnp.float32)                       # [BN, 1]
    degree = ax[:, D:D + 1] * mask_col                                 # [BN, 1]

    # one lane-dense (128-wide) head matmul for assign|embed|deg|att_feat|att
    y = jnp.dot(ax.astype(jnp.bfloat16), w,
                preferred_element_type=jnp.float32)                    # [BN, 128]

    # masked softmax over the assign head (EUP reciprocal, denominator >= 1)
    logits = y[:, :A]
    m = jnp.max(logits, axis=-1, keepdims=True)
    e = jnp.exp(logits - m)
    inv = pl.reciprocal(jnp.sum(e, axis=-1, keepdims=True), approx=True)
    assign_sm = e * inv * mask_col                                     # [BN, A]

    feats_r = jnp.maximum(y[:, A:A + 3 * H], 0.0) * mask_col           # [BN, 3H]
    att_sm = y[:, A + 3 * H:A + 3 * H + 1] * mask_col                  # [BN, 1]

    # single lane-dense output block: fixed column slices, no concatenate
    C = A + 3 * H + 1
    out_ref[:, 0:A] = assign_sm
    out_ref[:, A:A + 3 * H] = feats_r
    out_ref[:, A + 3 * H:A + 3 * H + 1] = att_sm
    out_ref[:, C:C + 1] = degree
    out_ref[:, C + 1:] = jnp.zeros((B * N, 128 - C - 1), jnp.float32)

    # per-graph coarse features: H_coarse[b] = assign[b]^T @ H_embed[b]
    for b in range(B):
        a_b = assign_sm[b * N:(b + 1) * N]                             # [N, A]
        h_b = feats_r[b * N:(b + 1) * N, :H]                           # [N, H]
        hc_ref[b] = jax.lax.dot_general(
            a_b, h_b, dimension_numbers=(((0,), (0,)), ((), ())),
            preferred_element_type=jnp.float32)                        # [A, H]


def fused_heads(adj, X, mask, params):
    """One pallas_call, one grid step, block-diagonal batch packing."""
    B, N, D = X.shape
    A = params["w_assign"].shape[1]
    H = params["w_embed"].shape[1]
    C = A + 3 * H + 1
    C_pad = 128
    assert C + 1 <= C_pad, "head width must fit one 128-lane output tile"
    BN = B * N

    w_all = jnp.concatenate(
        [params["w_assign"], params["w_embed"], params["w_deg"],
         params["w_att_feat"], params["w_att"]], axis=1)                # [D, C]
    # extra zero row so the appended mask column of x_aug is ignored by heads
    w_all = jnp.pad(w_all, ((0, 1), (0, C_pad - C))).astype(jnp.bfloat16)

    # block-diagonal packing: one (BN, BN) adjacency, one (BN, D+1) feature slab
    adj_bf = adj.astype(jnp.bfloat16)                                   # 0/1 exact
    adj_bd = jnp.zeros((BN, BN), jnp.bfloat16)
    for b in range(B):
        adj_bd = adj_bd.at[b * N:(b + 1) * N, b * N:(b + 1) * N].set(adj_bf[b])
    x_aug = jnp.concatenate([X, mask[..., None]], axis=-1)              # [B, N, D+1]
    x_flat = x_aug.reshape(BN, D + 1).astype(jnp.bfloat16)

    out_flat, h_coarse = pl.pallas_call(
        partial(_fused_heads_kernel, A=A, H=H, D=D, B=B, N=N),
        out_shape=(jax.ShapeDtypeStruct((BN, C_pad), jnp.float32),
                   jax.ShapeDtypeStruct((B, A, H), jnp.float32)),
        grid=(1,),
        in_specs=[
            pl.BlockSpec((BN, BN), lambda i: (0, 0)),
            pl.BlockSpec((BN, D + 1), lambda i: (0, 0)),
            pl.BlockSpec((D + 1, C_pad), lambda i: (0, 0)),
        ],
        out_specs=(
            pl.BlockSpec((BN, C_pad), lambda i: (0, 0)),
            pl.BlockSpec((B, A, H), lambda i: (0, 0, 0)),
        ),
        compiler_params=pltpu.CompilerParams(
            dimension_semantics=("arbitrary",)),
    )(adj_bd, x_flat, w_all)
    return out_flat.reshape(B, N, C_pad), h_coarse


def _pool_adj_kernel(union_ref, adj_ref, maskc_ref, o_ref, s_buf, *, B, K):
    """new_adj[b] = S @ adj[b] @ S^T with S = adj[b][union rows] * mask.

    S is gathered in-kernel from SMEM row indices (scalar prefetch), so the
    [B, K, N] S_reserve never round-trips through HBM.
    """
    for b in range(B):
        adj_b = adj_ref.at[b]                                           # [N, N] view
        for j in range(K):
            s_buf[pl.ds(j, 1), :] = adj_b[pl.ds(union_ref[b, j], 1), :]
        s = s_buf[...] * maskc_ref[b]                                   # [K, N] bf16
        sa = jnp.dot(s, adj_b[...], preferred_element_type=jnp.float32)  # [K, N]
        o_ref[b] = jax.lax.dot_general(
            sa.astype(jnp.bfloat16), s,
            dimension_numbers=(((1,), (1,)), ((), ())),
            preferred_element_type=jnp.float32)                         # [K, K]


def pooled_adjacency(adj, union_pad, new_mask):
    B, N, _ = adj.shape
    K = union_pad.shape[1]
    return pl.pallas_call(
        partial(_pool_adj_kernel, B=B, K=K),
        out_shape=jax.ShapeDtypeStruct((B, K, K), jnp.float32),
        grid_spec=pltpu.PrefetchScalarGridSpec(
            num_scalar_prefetch=1,
            grid=(1,),
            in_specs=[
                pl.BlockSpec((B, N, N), lambda i, u: (0, 0, 0)),
                pl.BlockSpec((B, K, 1), lambda i, u: (0, 0, 0)),
            ],
            out_specs=pl.BlockSpec((B, K, K), lambda i, u: (0, 0, 0)),
            scratch_shapes=[pltpu.VMEM((K, N), jnp.bfloat16)],
        ),
        compiler_params=pltpu.CompilerParams(
            dimension_semantics=("arbitrary",)),
    )(union_pad.astype(jnp.int32), adj.astype(jnp.bfloat16),
      new_mask[..., None].astype(jnp.bfloat16))


# --------------------------------------------------------------------------
# Synthetic stand-ins / parameters (sub-block definitions not provided upstream)
# --------------------------------------------------------------------------

class Args:
    hidden_dim = 32
    diffPool_max_num_nodes = 16
    diffPool_num_classes = 2
    diffPool_num_gcn_layer = 3
    diffPool_assign_ratio = 0.5
    diffPool_num_pool = 1
    diffPool_bn = False
    diffPool_dropout = 0.0
    local_topology = True
    with_feature = True
    global_topology = True
    readout = "mean"
    pool_ratio = 0.5


def init_params(key, input_dim, hidden_dim, assign_dim):
    # TODO(synk): DegreePickBlock / AttPoolBlock / SoftPoolingGcnEncoder source
    # was not provided; these GCN-style heads are deterministic stand-ins.
    k = jax.random.split(key, 5)
    scale = 1.0 / math.sqrt(input_dim)
    return {
        "w_assign": jax.random.normal(k[0], (input_dim, assign_dim), jnp.float32) * scale,
        "w_embed": jax.random.normal(k[1], (input_dim, hidden_dim), jnp.float32) * scale,
        "w_deg": jax.random.normal(k[2], (input_dim, hidden_dim), jnp.float32) * scale,
        "w_att_feat": jax.random.normal(k[3], (input_dim, hidden_dim), jnp.float32) * scale,
        "w_att": jax.random.normal(k[4], (input_dim, 1), jnp.float32) * scale,
    }


# --------------------------------------------------------------------------
# Device stages
# --------------------------------------------------------------------------

@jax.jit
def device_stage1(X, adj, mask, params):
    """Fused heads + top-k orderings + reordered feature matrices (fixed shapes)."""
    A = params["w_assign"].shape[1]
    H = params["w_embed"].shape[1]
    out, H_coarse = fused_heads(adj, X, mask, params)

    assign = out[..., :A]
    feats = out[..., A:A + 3 * H]
    att_score = out[..., A + 3 * H]
    degree = out[..., A + 3 * H + 1]

    neg = jnp.float32(-jnp.inf)
    # TODO(synk): argsort tie-breaking may differ from torch.topk on equal scores.
    order_deg = jnp.argsort(-jnp.where(mask > 0, degree, neg), axis=-1)
    order_att = jnp.argsort(-jnp.where(mask > 0, att_score, neg), axis=-1)

    H_deg = feats[..., H:2 * H]
    H_att = feats[..., 2 * H:3 * H]
    H1 = jnp.take_along_axis(H_deg, order_deg[..., None], axis=1)
    H2 = jnp.take_along_axis(H_att, order_att[..., None], axis=1)
    return assign, H_coarse, H1, H2, order_deg, order_att


@jax.jit
def device_stage2(adj, H1, H2, union_pad, new_mask, src1, src2, w1, w2):
    """Jitted; K is bucketed to a multiple of 8 so only a few variants compile."""
    new_adj = pooled_adjacency(adj, union_pad, new_mask)                # fused gather + S adj S^T
    g1 = jnp.take_along_axis(H1, src1[..., None], axis=1)
    g2 = jnp.take_along_axis(H2, src2[..., None], axis=1)
    new_H = w1[..., None] * g1 + w2[..., None] * g2
    return new_H, new_adj


# --------------------------------------------------------------------------
# MuchPool forward (host-side index bookkeeping mirrors the PyTorch code)
# --------------------------------------------------------------------------

def much_pool_forward(X, adj, mask, params, args):
    B, N, _ = X.shape
    ratio = args.pool_ratio

    assign, H_coarse, H1, H2, order_deg, order_att = device_stage1(X, adj, mask, params)

    # single host sync for the irregular set bookkeeping
    order_deg_h, order_att_h, mask_h = jax.device_get((order_deg, order_att, mask))

    k_list1 = [max(1, int(math.ceil(ratio * float(s)))) for s in mask_h.sum(axis=-1)]
    k_list2 = k_list1
    index1 = [x[:k] for x, k in zip(order_deg_h.tolist(), k_list1)]
    index2 = [y[:k] for y, k in zip(order_att_h.tolist(), k_list2)]
    intersection_index = [list(set(x) & set(y)) for x, y in zip(index1, index2)]
    union_index = [list(set(x) | set(y)) for x, y in zip(index1, index2)]
    k_list = [len(u) for u in union_index]
    k_max = max(k_list)
    # bucket K to the next multiple of 8 so device_stage2 compiles a handful of variants
    k_pad = ((max(k_max, 1) + 7) // 8) * 8

    # small host-built tables (only these go host -> device)
    union_pad = np.zeros((B, k_pad), dtype=np.int32)
    new_mask = np.zeros((B, k_pad), dtype=np.float32)
    src1 = np.zeros((B, k_pad), dtype=np.int32)
    src2 = np.zeros((B, k_pad), dtype=np.int32)
    w1 = np.zeros((B, k_pad), dtype=np.float32)
    w2 = np.zeros((B, k_pad), dtype=np.float32)
    for i, k in enumerate(k_list):
        new_mask[i, :k] = 1.0
        set1, set2 = set(index1[i]), set(index2[i])
        inter = set(intersection_index[i])
        for j, node in enumerate(union_index[i]):
            union_pad[i, j] = node
            if node in inter:
                src1[i, j] = index1[i].index(node)
                src2[i, j] = index2[i].index(node)
                w1[i, j] = 0.5
                w2[i, j] = 0.5
            elif node in set1:
                src1[i, j] = index1[i].index(node)
                w1[i, j] = 1.0
            else:  # node in set2 only
                src2[i, j] = index2[i].index(node)
                w2[i, j] = 1.0

    new_H_p, new_adj_p = device_stage2(
        adj, H1, H2,
        jnp.asarray(union_pad), jnp.asarray(new_mask),
        jnp.asarray(src1), jnp.asarray(src2),
        jnp.asarray(w1), jnp.asarray(w2))

    # trim the K bucket padding back to the data-dependent k_max (reference shapes)
    new_H = new_H_p[:, :k_max]
    new_adj = new_adj_p[:, :k_max, :k_max]
    new_mask_out = jnp.asarray(new_mask[:, :k_max])
    return new_H, new_adj, new_mask_out


# --------------------------------------------------------------------------
# main
# --------------------------------------------------------------------------

if __name__ == "__main__":
    args = Args()
    B, N, D = 2, 16, 32
    assign_dim = int(args.diffPool_max_num_nodes * args.diffPool_assign_ratio)

    key = jax.random.PRNGKey(0)
    kx, ka, kp = jax.random.split(key, 3)

    X = jax.random.normal(kx, (B, N, D), jnp.float32)
    a = (jax.random.uniform(ka, (B, N, N)) > 0.6).astype(jnp.float32)
    adj = jnp.clip(a + jnp.transpose(a, (0, 2, 1)), 0.0, 1.0)

    mask_np = np.ones((B, N), dtype=np.float32)
    mask_np[1, 12:] = 0.0                         # second graph has 12 valid nodes
    mask = jnp.asarray(mask_np)
    adj = adj * mask[:, :, None] * mask[:, None, :]
    X = X * mask[..., None]

    params = init_params(kp, D, args.hidden_dim, assign_dim)

    new_H, new_adj, new_mask = much_pool_forward(X, adj, mask, params, args)
    jax.block_until_ready((new_H, new_adj, new_mask))
    print("KERNEL_OK")
</pallas_src>

<mosaic_0001>
module attributes {stable_mosaic.version = 11 : i64} {
  func.func @_fused_heads_kernel(%arg0: i32, %arg1: memref<32x32xbf16, #tpu.memory_space<vmem>>, %arg2: memref<32x33xbf16, #tpu.memory_space<vmem>>, %arg3: memref<33x128xbf16, #tpu.memory_space<vmem>>, %arg4: memref<32x128xf32, #tpu.memory_space<vmem>>, %arg5: memref<2x8x32xf32, #tpu.memory_space<vmem>>) attributes {dimension_semantics = [#tpu.dimension_semantics<arbitrary>], iteration_bounds = array<i64: 1>, scalar_prefetch = 0 : i64, scratch_operands = 0 : i64, tpu.core_type = #tpu.core_type<tc>, window_params = [{pipeline_mode = #tpu.pipeline_mode<synchronous>, transform_indices = @transform_0, window_bounds = array<i64: 32, 32>}, {pipeline_mode = #tpu.pipeline_mode<synchronous>, transform_indices = @transform_1, window_bounds = array<i64: 32, 33>}, {pipeline_mode = #tpu.pipeline_mode<synchronous>, transform_indices = @transform_2, window_bounds = array<i64: 33, 128>}, {pipeline_mode = #tpu.pipeline_mode<synchronous>, transform_indices = @transform_3, window_bounds = array<i64: 32, 128>}, {pipeline_mode = #tpu.pipeline_mode<synchronous>, transform_indices = @transform_4, window_bounds = array<i64: 2, 8, 32>}]} {
    %c0 = arith.constant 0 : index
    %c0_0 = arith.constant 0 : index
    %0 = vector.load %arg1[%c0, %c0_0] : memref<32x32xbf16, #tpu.memory_space<vmem>>, vector<32x32xbf16>
    %c0_1 = arith.constant 0 : index
    %c0_2 = arith.constant 0 : index
    %1 = vector.load %arg2[%c0_1, %c0_2] : memref<32x33xbf16, #tpu.memory_space<vmem>>, vector<32x33xbf16>
    %c0_3 = arith.constant 0 : index
    %c0_4 = arith.constant 0 : index
    %2 = vector.load %arg3[%c0_3, %c0_4] : memref<33x128xbf16, #tpu.memory_space<vmem>>, vector<33x128xbf16>
    %cst = arith.constant dense<0.000000e+00> : vector<32x33xf32>
    %3 = tpu.matmul %0, %1, %cst {dimension_numbers = #tpu.dot_dimension_numbers<[1], [0], [0], [1], [0, 0, 1, 1], [], []>} : vector<32x32xbf16>, vector<32x33xbf16>, vector<32x33xf32> -> vector<32x33xf32>
    %4 = vector.extract_strided_slice %1 {offsets = [0, 32], sizes = [32, 1], strides = [1, 1]} : vector<32x33xbf16> to vector<32x1xbf16>
    %5 = arith.extf %4 : vector<32x1xbf16> to vector<32x1xf32>
    %6 = vector.extract_strided_slice %3 {offsets = [0, 32], sizes = [32, 1], strides = [1, 1]} : vector<32x33xf32> to vector<32x1xf32>
    %7 = arith.mulf %6, %5 : vector<32x1xf32>
    %8 = arith.truncf %3 : vector<32x33xf32> to vector<32x33xbf16>
    %cst_5 = arith.constant dense<0.000000e+00> : vector<32x128xf32>
    %9 = tpu.matmul %8, %2, %cst_5 {dimension_numbers = #tpu.dot_dimension_numbers<[1], [0], [0], [1], [0, 0, 1, 1], [], []>} : vector<32x33xbf16>, vector<33x128xbf16>, vector<32x128xf32> -> vector<32x128xf32>
    %10 = vector.extract_strided_slice %9 {offsets = [0, 0], sizes = [32, 8], strides = [1, 1]} : vector<32x128xf32> to vector<32x8xf32>
    %cst_6 = arith.constant dense<0xFF800000> : vector<32xf32>
    %11 = vector.multi_reduction <maximumf>, %10, %cst_6 [1] : vector<32x8xf32> to vector<32xf32>
    %12 = vector.shape_cast %11 : vector<32xf32> to vector<32x1xf32>
    %13 = vector.broadcast %12 : vector<32x1xf32> to vector<32x8xf32>
    %14 = arith.subf %10, %13 : vector<32x8xf32>
    %15 = math.exp %14 : vector<32x8xf32>
    %cst_7 = arith.constant dense<0.000000e+00> : vector<32xf32>
    %16 = vector.multi_reduction <add>, %15, %cst_7 [1] : vector<32x8xf32> to vector<32xf32>
    %17 = vector.shape_cast %16 : vector<32xf32> to vector<32x1xf32>
    %18 = tpu.reciprocal %17 {approx = true} : vector<32x1xf32> -> vector<32x1xf32>
    %19 = vector.broadcast %18 : vector<32x1xf32> to vector<32x8xf32>
    %20 = arith.mulf %15, %19 : vector<32x8xf32>
    %21 = vector.broadcast %5 : vector<32x1xf32> to vector<32x8xf32>
    %22 = arith.mulf %20, %21 : vector<32x8xf32>
    %23 = vector.extract_strided_slice %9 {offsets = [0, 8], sizes = [32, 96], strides = [1, 1]} : vector<32x128xf32> to vector<32x96xf32>
    %cst_8 = arith.constant 0.000000e+00 : f32
    %24 = vector.broadcast %cst_8 : f32 to vector<32x96xf32>
    %25 = arith.maximumf %23, %24 : vector<32x96xf32>
    %26 = vector.broadcast %5 : vector<32x1xf32> to vector<32x96xf32>
    %27 = arith.mulf %25, %26 : vector<32x96xf32>
    %28 = vector.extract_strided_slice %9 {offsets = [0, 104], sizes = [32, 1], strides = [1, 1]} : vector<32x128xf32> to vector<32x1xf32>
    %29 = arith.mulf %28, %5 : vector<32x1xf32>
    %c0_9 = arith.constant 0 : index
    %c0_10 = arith.constant 0 : index
    %30 = vector.load %arg4[%c0_9, %c0_10] : memref<32x128xf32, #tpu.memory_space<vmem>>, vector<32x8xf32>
    tpu.vector_store %arg4[%c0_9, %c0_10], %22 {strides = array<i32>} : memref<32x128xf32, #tpu.memory_space<vmem>>, vector<32x8xf32>,
    %c0_11 = arith.constant 0 : index
    %c8 = arith.constant 8 : index
    %31 = vector.load %arg4[%c0_11, %c8] : memref<32x128xf32, #tpu.memory_space<vmem>>, vector<32x96xf32>
    tpu.vector_store %arg4[%c0_11, %c8], %27 {strides = array<i32>} : memref<32x128xf32, #tpu.memory_space<vmem>>, vector<32x96xf32>,
    %c0_12 = arith.constant 0 : index
    %c104 = arith.constant 104 : index
    %32 = vector.load %arg4[%c0_12, %c104] : memref<32x128xf32, #tpu.memory_space<vmem>>, vector<32x1xf32>
    tpu.vector_store %arg4[%c0_12, %c104], %29 {strides = array<i32>} : memref<32x128xf32, #tpu.memory_space<vmem>>, vector<32x1xf32>,
    %c0_13 = arith.constant 0 : index
    %c105 = arith.constant 105 : index
    %33 = vector.load %arg4[%c0_13, %c105] : memref<32x128xf32, #tpu.memory_space<vmem>>, vector<32x1xf32>
    tpu.vector_store %arg4[%c0_13, %c105], %7 {strides = array<i32>} : memref<32x128xf32, #tpu.memory_space<vmem>>, vector<32x1xf32>,
    %cst_14 = arith.constant 0.000000e+00 : f32
    %34 = vector.broadcast %cst_14 : f32 to vector<32x22xf32>
    %c0_15 = arith.constant 0 : index
    %c106 = arith.constant 106 : index
    %35 = vector.load %arg4[%c0_15, %c106] : memref<32x128xf32, #tpu.memory_space<vmem>>, vector<32x22xf32>
    tpu.vector_store %arg4[%c0_15, %c106], %34 {strides = array<i32>} : memref<32x128xf32, #tpu.memory_space<vmem>>, vector<32x22xf32>,
    %36 = vector.extract_strided_slice %22 {offsets = [0, 0], sizes = [16, 8], strides = [1, 1]} : vector<32x8xf32> to vector<16x8xf32>
    %37 = vector.extract_strided_slice %27 {offsets = [0, 0], sizes = [16, 32], strides = [1, 1]} : vector<32x96xf32> to vector<16x32xf32>
    %cst_16 = arith.constant dense<0.000000e+00> : vector<8x32xf32>
    %38 = tpu.matmul %36, %37, %cst_16 {dimension_numbers = #tpu.dot_dimension_numbers<[0], [0], [1], [1], [0, 1, 1, 1], [], []>} : vector<16x8xf32>, vector<16x32xf32>, vector<8x32xf32> -> vector<8x32xf32>
    %c0_17 = arith.constant 0 : index
    %c0_18 = arith.constant 0 : index
    %c0_19 = arith.constant 0 : index
    %39 = vector.load %arg5[%c0_17, %c0_18, %c0_19] : memref<2x8x32xf32, #tpu.memory_space<vmem>>, vector<1x8x32xf32>
    %40 = vector.shape_cast %39 : vector<1x8x32xf32> to vector<8x32xf32>
    %41 = vector.shape_cast %38 : vector<8x32xf32> to vector<1x8x32xf32>
    tpu.vector_store %arg5[%c0_17, %c0_18, %c0_19], %41 {strides = array<i32>} : memref<2x8x32xf32, #tpu.memory_space<vmem>>, vector<1x8x32xf32>,
    %42 = vector.extract_strided_slice %22 {offsets = [16, 0], sizes = [16, 8], strides = [1, 1]} : vector<32x8xf32> to vector<16x8xf32>
    %43 = vector.extract_strided_slice %27 {offsets = [16, 0], sizes = [16, 32], strides = [1, 1]} : vector<32x96xf32> to vector<16x32xf32>
    %cst_20 = arith.constant dense<0.000000e+00> : vector<8x32xf32>
    %44 = tpu.matmul %42, %43, %cst_20 {dimension_numbers = #tpu.dot_dimension_numbers<[0], [0], [1], [1], [0, 1, 1, 1], [], []>} : vector<16x8xf32>, vector<16x32xf32>, vector<8x32xf32> -> vector<8x32xf32>
    %c1 = arith.constant 1 : index
    %c0_21 = arith.constant 0 : index
    %c0_22 = arith.constant 0 : index
    %45 = vector.load %arg5[%c1, %c0_21, %c0_22] : memref<2x8x32xf32, #tpu.memory_space<vmem>>, vector<1x8x32xf32>
    %46 = vector.shape_cast %45 : vector<1x8x32xf32> to vector<8x32xf32>
    %47 = vector.shape_cast %44 : vector<8x32xf32> to vector<1x8x32xf32>
    tpu.vector_store %arg5[%c1, %c0_21, %c0_22], %47 {strides = array<i32>} : memref<2x8x32xf32, #tpu.memory_space<vmem>>, vector<1x8x32xf32>,
    return
  }
  func.func @transform_0(%arg0: i32) -> (i32, i32) {
    %c0_i32 = arith.constant 0 : i32
    %c0_i32_0 = arith.constant 0 : i32
    %c0_i32_1 = arith.constant 0 : i32
    return %c0_i32, %c0_i32_0 : i32, i32
  }
  func.func @transform_1(%arg0: i32) -> (i32, i32) {
    %c0_i32 = arith.constant 0 : i32
    %c0_i32_0 = arith.constant 0 : i32
    %c0_i32_1 = arith.constant 0 : i32
    return %c0_i32, %c0_i32_0 : i32, i32
  }
  func.func @transform_2(%arg0: i32) -> (i32, i32) {
    %c0_i32 = arith.constant 0 : i32
    %c0_i32_0 = arith.constant 0 : i32
    %c0_i32_1 = arith.constant 0 : i32
    return %c0_i32, %c0_i32_0 : i32, i32
  }
  func.func @transform_3(%arg0: i32) -> (i32, i32) {
    %c0_i32 = arith.constant 0 : i32
    %c0_i32_0 = arith.constant 0 : i32
    %c0_i32_1 = arith.constant 0 : i32
    return %c0_i32, %c0_i32_0 : i32, i32
  }
  func.func @transform_4(%arg0: i32) -> (i32, i32, i32) {
    %c0_i32 = arith.constant 0 : i32
    %c0_i32_0 = arith.constant 0 : i32
    %c0_i32_1 = arith.constant 0 : i32
    %c0_i32_2 = arith.constant 0 : i32
    return %c0_i32, %c0_i32_0, %c0_i32_1 : i32, i32, i32
  }
}

</mosaic_0001>

<bundles_post_ra>
// kernel: device_stage1.1
= control target key start
LH: loop header
LB: loop body
LE: loop exit
PB: predicated region body
PF: predicated region fallthrough
CT: control target
= control target key end

     0   :  { %vm53_vm0 = vcmask 261120   ;;  %s982_s0 = inlined_call_operand.vmem [shape: bf16[32,32], index: 0, kind: input, shape index: {}]   ;;  %s983_s1 = inlined_call_operand.vmem [shape: bf16[32,33], index: 1, kind: input, shape index: {}]   ;;  %s984_s2 = inlined_call_operand.vmem [shape: bf16[33,128], index: 2, kind: input, shape index: {}]   ;;  %s985_s3 = inlined_call_operand.vmem [shape: f32[32,128], index: 3, kind: output, shape index: {0}]   ;;  %s986_s4 = inlined_call_operand.hbm [shape: f32[2,8,32], index: 4, kind: output, shape index: {1}]  }
   0x1   :  { %v776_v0 = vld [vmem:[%s983_s1] sm:$0xff]   ;;  %v781_v1 = vld [vmem:[%s983_s1 + $0x8] sm:$0xff]  }
   0x2   :  { %v690_v2 = vld [vmem:[%s982_s0] sm:$0xff]   ;;  %607 = vmatprep.subr.bf16.mxu0 %v776_v0  ;;  %v693_v4 = vld [vmem:[%s984_s2 + $0x8] sm:$0xff]  }
   0x3   :  { %611 = vmatprep.mubr.msk.bf16.mxu0 %vm53_vm0, %v690_v2  ;;  %v692_v3 = vld [vmem:[%s984_s2] sm:$0xff]   ;;  %608 = vmatpush3.bf16.msra.mxu0 %v776_v0 }
   0x4   :  { %609 = vmatprep.subr.bf16.mxu0 %v781_v1  ;;  %615 = vmatprep.subr.bf16.mxu1 %v692_v3 }
   0x5   :  { %10 = vsyncpa [#allocation3], 0  ;;  %616 = vmatpush3.bf16.msra.mxu1 %v692_v3  ;;  %v691_v5 = vld [vmem:[%s982_s0 + $0x8] sm:$0xff]   ;;  %v694_v6 = vld [vmem:[%s984_s2 + $0x10] ss:$0 sps:$4 sm:$0x11]   ;;  %v111_v25 = vunpack.c.l.bf16 %v781_v1  ;;  %v112_v26 = vunpack.c.h.bf16 %v781_v1  ;;  %v109_v28 = vunpack.c.l.bf16 %v776_v0  ;;  %v110_v29 = vunpack.c.h.bf16 %v776_v0 }
   0x6   :  { %617 = vmatprep.subr.bf16.mxu1 %v693_v4  ;;  %vm141_vm1 = vcmask 1040384   ;;  %v737_v7 = vmov 0   ;;  %vm134_vm2 = vcmask 269312   ;;  %v738_v16 = vmov 32   ;;  %s739_s0 = smov 120   ;;  %s743_s17 = smov 72  }
   0x7   :  { %610 = vmatpush3.bf16.msra.mxu0 %v781_v1  ;;  %v143_v8 = vsel %vm141_vm1, 65535, %v737_v7  ;;  %662 = vset.pattern.permute.xlu1 %v738_v16  ;;  %vm196_vm3 = vcmask 64512   ;;  %v838_v27 = vpack.i.bf16 %v112_v26, %v111_v25  ;;  %v847_v30 = vpack.i.bf16 %v110_v29, %v109_v28  ;;  %s744_s18 = smov 73   ;;  %s745_s14 = smov [#allocation2]  }
   0x8   :  { %v145_v9 = vand.u32 %v694_v6, %v143_v8  ;;  %656 = vset.pattern.permute.xlu0 %v738_v16  ;;  %vm741_vm4 = vmmov 0   ;;  %v742_v6 = vmov 0.0   ;;  %vm293_vm5 = vcmask 851008   ;;  %s566_s15 = sshll.u32 %s745_s14, 4  ;;  %s567_s15 = int_to_ptr.vmem [resolvable:$true] %s566_s15 }
   0x9   :  { %618 = vmatpush3.bf16.msra.mxu1 %v693_v4  ;;  %vm369_vm6 = vcmask 130048   ;;  %vm298_vm7 = vcmask 859968   ;;  %vm319_vm8 = vcmask 868168   ;;  %vm324_vm9 = vcmask 1048400   ;;  %s713_s16 = scalar_lea.vmem %s567_s15, 256  ;;  %p718_p1 = scmp.lt.s32.totalorder %s567_s15, %s567_s15 }
   0xa   :  { %612 = vmatmul.mubr.msk.bf16.vlgmr.msra.gmra.mrb[0].mxu0 %vm53_vm0, %v691_v5  ;;  %619 = vmatprep.subr.bf16.mxu1 %v145_v9  ;;  %v740_v5 = vmov 0.0|0.0   ;;  %p714_p0 = scmp.ne.s32.totalorder %s567_s15, %s713_s16  ;;  %p719_p2 = scmp.lt.s32.totalorder %s713_s16, %s713_s16 }
   0xb   :  { %639 = vmatprep.subr.bf16.mxu0 %v740_v5  ;;  %629 = vmatprep.mubr.msk.f32.mxu0 %vm741_vm4, %v742_v6 }
   0xc   :  { %p720_p3 = por %p719_p2, %p718_p1 }
   0xd   :  { %620 = vmatpush3.bf16.msra.mxu1 %v145_v9 }
   0xe   :  { %p721_p4 = pnand %p720_p3, %p714_p0 }
  0xdd   :  { %v804_v10 = vpop.f32.mrb[0].mxu0 }
  0xde   :  { %v806_v11 = vpop.f32.mrb[1].mxu0 }
  0xdf   :  { %v808_v12 = vpop.f32.mrb[2].mxu0 }
  0xe0   :  { %v118_v13 = vpack.c.bf16 %v808_v12, %v804_v10  ;;  %v812_v14 = vpop.f32.mrb[3].mxu0 }
  0xe1   :  { %v117_v15 = vpack.c.bf16 %v812_v14, %v806_v11 }
  0xe3   :  { %621 = vmatprep.mubr.msk.bf16.mxu1 %vm134_vm2, %v117_v15 }
  0xe4   :  { %622 = vmatmul.mubr.msk.bf16.vlgmr.msra.gmra.mrb[0].mxu1 %vm134_vm2, %v118_v13 }
 0x1b7   :  { %v816_v17 = vpop.f32.mrb[0].mxu1 }
 0x1b8   :  { %v818_v18 = vpop.f32.mrb[1].mxu1  ;;  %v203_v19 = vsel %vm196_vm3, %v816_v17, -inf  ;;  %v267_v59 = vmax.f32 %v816_v17, 0.0 }
 0x1b9   :  { %204 = vmax.xlane.f32.xlu1 %v203_v19  ;;  %v822_v20 = vpop.f32.mrb[2].mxu1  ;;  %v197_v21 = vsel %vm196_vm3, %v818_v18, -inf  ;;  %v265_v58 = vmax.f32 %v818_v18, 0.0 }
 0x1ba   :  { %198 = vmax.xlane.f32.xlu0 %v197_v21  ;;  %v826_v22 = vpop.f32.mrb[3].mxu1  ;;  %v206_v23 = vsel %vm196_vm3, %v822_v20, -inf  ;;  %v268_v60 = vmax.f32 %v822_v20, 0.0 }
 0x1bb   :  { %v200_v24 = vsel %vm196_vm3, %v826_v22, -inf  ;;  %v266_v57 = vmax.f32 %v826_v22, 0.0 }
 0x1bd   :  { %207 = vmax.xlane.f32.xlu1 %v206_v23 }
 0x1be   :  { %201 = vmax.xlane.f32.xlu0 %v200_v24 }
 0x1ce   :  { %664 = vperm.xlu1 %662, %v838_v27  }
 0x1d4   :  { %658 = vperm.xlu0 %656, %v847_v30  }
 0x246   :  { %v205_v31 = vpop.xlane.xlu1 %204 }
 0x247   :  { %v211_v32 = vsub.f32 %v816_v17, %v205_v31  ;;  %v199_v33 = vpop.xlane.xlu0 %198 }
 0x248   :  { %v209_v34 = vsub.f32 %v818_v18, %v199_v33 }
 0x249   :  { %v217_v35 = vmul.f32 1.442695, %v211_v32 }
 0x24a   :  { %v213_v36 = vmul.f32 1.442695, %v209_v34  ;;  %v208_v37 = vpop.xlane.xlu1 %207 }
 0x24b   :  { %v212_v38 = vsub.f32 %v822_v20, %v208_v37  ;;  %v202_v39 = vpop.xlane.xlu0 %201 }
 0x24c   :  { %697 = vpow2.f32 %v213_v36  ;;  %v210_v40 = vsub.f32 %v826_v22, %v202_v39 }
 0x24d   :  { %699 = vpow2.f32 %v217_v35  ;;  %v219_v41 = vmul.f32 1.442695, %v212_v38 }
 0x24e   :  { %v215_v42 = vmul.f32 1.442695, %v210_v40  ;;  %v665_v52 = vpop.permute.xlu1 %664 }
 0x24f   :  { %v667_v55 = vunpack.i.h.bf16 %v665_v52  ;;  %v666_v56 = vunpack.i.l.bf16 %v665_v52 }
 0x250   :  { %701 = vpow2.f32 %v215_v42  ;;  %v114_v42 = vmul.f32 %v110_v29, %v812_v14 }
 0x251   :  { %703 = vpow2.f32 %v219_v41  ;;  %v272_v63 = vmul.f32 %v667_v55, %v268_v60  ;;  %v271_v2 = vmul.f32 %v666_v56, %v267_v59  ;;  %v113_v41 = vmul.f32 %v109_v28, %v806_v11 }
 0x253   :  { %v659_v51 = vpop.permute.xlu0 %658  ;;  %v673_v4 = vpack.i.bf16 %v272_v63, %v271_v2 }
 0x254   :  { %v661_v53 = vunpack.i.h.bf16 %v659_v51  ;;  %v660_v54 = vunpack.i.l.bf16 %v659_v51 }
 0x256   :  { %v698_v43 = vpop.eup %697  ;;  %v270_v61 = vmul.f32 %v661_v53, %v266_v57  ;;  %v269_v62 = vmul.f32 %v660_v54, %v265_v58 }
 0x257   :  { %v221_v44 = vsel %vm196_vm3, %v698_v43, 0.0  ;;  %v700_v45 = vpop.eup %699 }
 0x258   :  { %222 = vadd.xlane.f32.xlu1 %v221_v44  ;;  %v227_v47 = vsel %vm196_vm3, %v700_v45, 0.0  ;;  %v668_v3 = vpack.i.bf16 %v270_v61, %v269_v62 }
 0x25a   :  { %v702_v46 = vpop.eup %701 }
 0x25b   :  { %v224_v48 = vsel %vm196_vm3, %v702_v46, 0.0  ;;  %v704_v49 = vpop.eup %703 }
 0x25c   :  { %228 = vadd.xlane.f32.xlu1 %v227_v47  ;;  %225 = vadd.xlane.f32.xlu0 %v224_v48  ;;  %v230_v50 = vsel %vm196_vm3, %v704_v49, 0.0 }
 0x260   :  { %231 = vadd.xlane.f32.xlu1 %v230_v50 }
 0x271   :  { %669 = vrot.lane.b32.xlu1 %v668_v3, %s739_s0 }
 0x272   :  { %674 = vrot.lane.b32.xlu0 %v673_v4, %s739_s0 }
 0x2e5   :  { %v223_v7 = vpop.xlane.xlu1 %222 }
 0x2e6   :  { %705 = vrcp.f32 %v223_v7 }
 0x2e9   :  { %v229_v8 = vpop.xlane.xlu1 %228  ;;  %v226_v9 = vpop.xlane.xlu0 %225 }
 0x2ea   :  { %707 = vrcp.f32 %v229_v8 }
 0x2eb   :  { %709 = vrcp.f32 %v226_v9 }
 0x2ed   :  { %v232_v13 = vpop.xlane.xlu1 %231  ;;  %v675_v11 = vpop.permute.xlu0 %674 }
 0x2ee   :  { %711 = vrcp.f32 %v232_v13  ;;  %v677_v28 = vunpack.i.h.bf16 %v675_v11  ;;  %v676_v44 = vunpack.i.l.bf16 %v675_v11 }
 0x2f0   :  { %v706_v15 = vpop.eup %705 }
 0x2f1   :  { %v670_v16 = vpop.permute.xlu1 %669  ;;  %v237_v19 = vmul.f32 %v706_v15, %v698_v43  ;;  %v115_v43 = vmul.f32 %v804_v10, %v111_v25 }
 0x2f2   :  { %v672_v21 = vunpack.i.h.bf16 %v670_v16  ;;  %v671_v23 = vunpack.i.l.bf16 %v670_v16 }
 0x2f3   :  { %v261_v24 = vmul.f32 %v660_v54, %v237_v19 }
 0x2f4   :  { %v708_v31 = vpop.eup %707  ;;  %v640_v32 = vpack.c.bf16 %v672_v21, %v671_v23 }
 0x2f5   :  { %v710_v33 = vpop.eup %709  ;;  %289 = vst.msk [vmem:[%s985_s3] sm:$0xff] %vm196_vm3, %v261_v24  ;;  %329 = vxpose.xlu1.b32.start [1/2] (short) (narrow) %v261_v24, 8  ;;  %v239_v34 = vmul.f32 %v708_v31, %v700_v45  ;;  %v643_v45 = vpack.c.bf16 %v677_v28, %v676_v44 }
 0x2f6   :  { %641 = vmatpush3.bf16.msra.mxu0 %v640_v32  ;;  %294 = vst.msk [vmem:[%s985_s3] sm:$0xff] %vm293_vm5, %v269_v62  ;;  %v238_v35 = vmul.f32 %v710_v33, %v702_v46 }
 0x2f7   :  { %v263_v36 = vmul.f32 %v666_v56, %v239_v34  ;;  %642 = vmatprep.subr.bf16.mxu0 %v740_v5 }
 0x2f8   :  { %v712_v37 = vpop.eup %711  ;;  %v262_v38 = vmul.f32 %v661_v53, %v238_v35 }
 0x2f9   :  { %291 = vst.msk [vmem:[%s985_s3 + $0x10] sm:$0xff] %vm196_vm3, %v263_v36  ;;  %444 = vxpose.xlu0.b32.start [1/2] (short) (narrow) %v263_v36, 8  ;;  %v240_v39 = vmul.f32 %v712_v37, %v704_v49 }
 0x2fa   :  { %296 = vst.msk [vmem:[%s985_s3 + $0x10] sm:$0xff] %vm293_vm5, %v271_v2  ;;  %330 = vxpose.xlu1.b32.end [2/2] (short) (narrow) %v262_v38, 8 }
 0x2fb   :  { %290 = vst.msk [vmem:[%s985_s3 + $0x8] sm:$0xff] %vm196_vm3, %v262_v38  ;;  %v264_v40 = vmul.f32 %v667_v55, %v240_v39 }
 0x2fc   :  { %295 = vst.msk [vmem:[%s985_s3 + $0x8] sm:$0xff] %vm293_vm5, %v270_v61 }
 0x2fd   :  { %445 = vxpose.xlu0.b32.end [2/2] (short) (narrow) %v264_v40, 8  ;;  %292 = vst.msk [vmem:[%s985_s3 + $0x18] sm:$0xff] %vm196_vm3, %v264_v40 }
 0x2fe   :  { %297 = vst.msk [vmem:[%s985_s3 + $0x18] sm:$0xff] %vm293_vm5, %v272_v63 }
 0x318   :  { %679 = vrot.lane.b32.xlu1 %v847_v30, %s743_s17  ;;  %v116_v30 = vmul.f32 %v808_v12, %v112_v26 }
 0x31c   :  { %307 = vrot.lane.b32.xlu1 %v113_v41, %s744_s18 }
 0x320   :  { %309 = vrot.lane.b32.xlu1 %v114_v42, %s744_s18 }
 0x324   :  { %311 = vrot.lane.b32.xlu1 %v115_v43, %s744_s18 }
 0x326   :  { %684 = vrot.lane.b32.xlu0 %v838_v27, %s743_s17 }
 0x328   :  { %313 = vrot.lane.b32.xlu1 %v116_v30, %s744_s18 }
 0x376   :  { %v345_v0 = vpop.trf.xlu1 }
 0x377   :  { %630 = vmatmul.mubr.msk.f32.vlgmr.msra.gmra.mrb[4].mxu0 %vm369_vm6, %v345_v0 }
 0x378   :  { %644 = vmatpush3.bf16.msra.mxu0 %v643_v45  ;;  %636 = vmatprep.mubr.msk.f32.mxu0 %vm741_vm4, %v742_v6 }
 0x379   :  { %v460_v10 = vpop.trf.xlu0 }
 0x37b   :  { %637 = vmatmul.mubr.msk.f32.vlgmr.msra.gmra.mrb[6].mxu0 %vm369_vm6, %v460_v10 }
 0x38a   :  { %v680_v14 = vpop.permute.xlu1 %679 }
 0x38b   :  { %v682_v1 = vunpack.i.h.bf16 %v680_v14  ;;  %v681_v25 = vunpack.i.l.bf16 %v680_v14 }
 0x38d   :  { %v286_v12 = vmul.f32 %v682_v1, %v826_v22  ;;  %v285_v26 = vmul.f32 %v681_v25, %v818_v18 }
 0x38e   :  { %v308_v27 = vpop.permute.xlu1 %307 }
 0x38f   :  { %299 = vst.msk [vmem:[%s985_s3] sm:$0xff] %vm298_vm7, %v285_v26  ;;  %300 = vst.msk [vmem:[%s985_s3 + $0x8] sm:$0xff] %vm298_vm7, %v286_v12 }
 0x390   :  { %320 = vst.msk [vmem:[%s985_s3] sm:$0xff] %vm319_vm8, %v308_v27 }
 0x391   :  { %325 = vst.msk [vmem:[%s985_s3] sm:$0xff] %vm324_vm9, %v742_v6 }
 0x392   :  { %v310_v18 = vpop.permute.xlu1 %309 }
 0x393   :  { %321 = vst.msk [vmem:[%s985_s3 + $0x8] sm:$0xff] %vm319_vm8, %v310_v18 }
 0x394   :  { %326 = vst.msk [vmem:[%s985_s3 + $0x8] sm:$0xff] %vm324_vm9, %v742_v6 }
 0x396   :  { %v312_v22 = vpop.permute.xlu1 %311 }
 0x398   :  { %v685_v29 = vpop.permute.xlu0 %684 }
 0x399   :  { %v687_v46 = vunpack.i.h.bf16 %v685_v29  ;;  %v686_v47 = vunpack.i.l.bf16 %v685_v29 }
 0x39a   :  { %v314_v50 = vpop.permute.xlu1 %313 }
 0x39b   :  { %v288_v48 = vmul.f32 %v687_v46, %v822_v20  ;;  %v287_v49 = vmul.f32 %v686_v47, %v816_v17 }
 0x39d   :  { %301 = vst.msk [vmem:[%s985_s3 + $0x10] sm:$0xff] %vm298_vm7, %v287_v49  ;;  %302 = vst.msk [vmem:[%s985_s3 + $0x18] sm:$0xff] %vm298_vm7, %v288_v48 }
 0x39e   :  { %322 = vst.msk [vmem:[%s985_s3 + $0x10] sm:$0xff] %vm319_vm8, %v312_v22  ;;  %323 = vst.msk [vmem:[%s985_s3 + $0x18] sm:$0xff] %vm319_vm8, %v314_v50 }
 0x39f   :  { %327 = vst.msk [vmem:[%s985_s3 + $0x10] sm:$0xff] %vm324_vm9, %v742_v6  ;;  %328 = vst.msk [vmem:[%s985_s3 + $0x18] sm:$0xff] %vm324_vm9, %v742_v6 }
 0x44a   :  { %v439_v17 = vpop.f32.mrb[4].mxu0 }
 0x44b   :  { %443 = vst.msk [vmem:[#allocation2] sm:$0xff] %vm53_vm0, %v439_v17  ;;  %v631_v20 = vpop.f32.mrb[5].mxu0 }
 0x44e   :  { %v553_v51 = vpop.f32.mrb[6].mxu0 }
 0x44f   :  { %558 = vst.msk [vmem:[#allocation2 + $0x8] sm:$0xff] %vm53_vm0, %v553_v51  ;;  %v638_v52 = vpop.f32.mrb[7].mxu0 }
 0x450   :  { %724 = shalt.err (!%p721_p4)
}
 0x451   :  { %s725_s18 = scalar_lea.hbm %s986_s4, 256 }
 0x452   :  { %p726_p5 = scmp.ne.s32.totalorder %s986_s4, %s725_s18  ;;  %p729_p6 = scmp.lt.u32.totalorder %s725_s18, %s986_s4 }
 0x454   :  { %p731_p7 = pnand %p729_p6, %p726_p5 }
 0x456   :  { %734 = shalt.err (!%p731_p7)
}
 0x457   :  { %s746_s23 = smov 128   ;;  %s747_s24 = smov 8  }
 0x458   :  { %572 = dma.vmem_to_hbm [thread:$0]  %s567_s15, 256, %s986_s4, [#allocation3], %s746_s23, %s746_s23, %s747_s24  }
 0x459   :  { %735 = dma.done.wait [#allocation3], 256  }
 0x45a   :  { %736 = vsyncadd [#allocation3], 4294967040 }
 0x45b   :  { %578 = vsyncpa [#allocation3], 1 }

</bundles_post_ra>
